<compile_context>
chip_gen: v5e
topology: v5e:2x2
jax: 0.10.0
libtpu: 0.0.40
codegen_flags: <defaults>
</compile_context>

<pallas_src>
import jax
import jax.numpy as jnp
from jax.experimental import pallas as pl
from jax.experimental.pallas import tpu as pltpu

LANE = 128


def _round_up(x, m):
    return ((x + m - 1) // m) * m


# ----------------------------- Pallas kernel ------------------------------- #
def _mcn_fused_kernel(t_ref, v_ref, a_ref,
                      wt_ref, wv_ref, wa_ref,
                      bt_ref, bv_ref, ba_ref,
                      wc_ref, bc_ref, out_ref):
    """One batch tile of the fused MCN backbone.

    t/v/a_ref : (TB, T*D*)  f32   time-flattened modality features
    w*_ref    : (T*D*, H)   bf16  projection weights, T-tiled, 1/T folded in
    b*_ref    : (1, H)      f32   projection biases
    wc_ref    : (H, Cp)     bf16  classifier weights (lane-padded to 128)
    bc_ref    : (1, Cp)     f32   classifier bias (lane-padded)
    out_ref   : (TB, Cp)    f32   lane-dense logits (wrapper slices back to C)
    """
    # Temporal mean-pool + Linear fused into one MXU matmul per modality
    # (the 1/T mean scale lives in the T-tiled weights); f32 accumulation.
    ht = jnp.dot(t_ref[...].astype(jnp.bfloat16), wt_ref[...],
                 preferred_element_type=jnp.float32)
    hv = jnp.dot(v_ref[...].astype(jnp.bfloat16), wv_ref[...],
                 preferred_element_type=jnp.float32)
    ha = jnp.dot(a_ref[...].astype(jnp.bfloat16), wa_ref[...],
                 preferred_element_type=jnp.float32)

    # Per-modality bias + ReLU (f32 VPU), then linear sum fusion.
    ht = jnp.maximum(ht + bt_ref[...], 0.0)
    hv = jnp.maximum(hv + bv_ref[...], 0.0)
    ha = jnp.maximum(ha + ba_ref[...], 0.0)
    fused = ht + hv + ha                                     # (TB, H) f32

    # Classifier head; Cp is a multiple of 128 -> unmasked lane-dense stores.
    logits = jnp.dot(fused.astype(jnp.bfloat16), wc_ref[...],
                     preferred_element_type=jnp.float32)
    out_ref[...] = (logits + bc_ref[...]).astype(out_ref.dtype)


# --------------------------- parameter packing ------------------------------ #
def pack_params(params, seq_len):
    """Fold the temporal mean into T-tiled projection weights; lane-pad head."""
    def fold(w):
        # W_big[t*D + d, h] = w[d, h] / T  =>  x.reshape(B, T*D) @ W_big
        #                                   == mean_t(x) @ w
        return (jnp.tile(w, (seq_len, 1)) / float(seq_len)).astype(jnp.bfloat16)

    hidden = params["wt"].shape[1]
    num_classes = params["wc"].shape[1]
    c_pad = _round_up(num_classes, LANE)                     # lane-dense logits
    wc_p = jnp.zeros((hidden, c_pad), jnp.float32).at[:, :num_classes].set(params["wc"])
    bc_p = jnp.zeros((1, c_pad), jnp.float32).at[:, :num_classes].set(params["bc"])

    return dict(
        wt=fold(params["wt"]), wv=fold(params["wv"]), wa=fold(params["wa"]),
        bt=params["bt"].astype(jnp.float32),
        bv=params["bv"].astype(jnp.float32),
        ba=params["ba"].astype(jnp.float32),
        wc=wc_p.astype(jnp.bfloat16),
        bc=bc_p,
        hidden=int(hidden),
        num_classes=int(num_classes),
    )


# ----------------------------- forward wrapper ------------------------------ #
def mcn_backbone_forward(text, video, audio, packed, *, block_b=512):
    """Synthetic MCN backbone forward: one batch-tiled fused Pallas kernel."""
    B, T, Dt = text.shape
    Dv, Da = video.shape[-1], audio.shape[-1]
    hidden = packed["hidden"]
    num_classes = packed["num_classes"]
    c_pad = packed["wc"].shape[1]

    # Free, contiguous reshapes (no HBM copies): (B, T, D) -> (B, T*D).
    t2 = text.reshape(B, T * Dt)
    v2 = video.reshape(B, T * Dv)
    a2 = audio.reshape(B, T * Da)

    # Large batch tiles (workload is memory/overhead-bound); keep the tile a
    # multiple of 8 unless it spans the whole batch.
    tb = min(block_b, B)
    if tb < B:
        tb = max(8, (tb // 8) * 8)
    grid = (pl.cdiv(B, tb),)

    in_bytes = 4 * B * T * (Dt + Dv + Da)
    w_bytes = sum(int(packed[k].size) * packed[k].dtype.itemsize
                  for k in ("wt", "wv", "wa", "bt", "bv", "ba", "wc", "bc"))
    out_bytes = 4 * B * c_pad
    flops = 2 * B * T * (Dt + Dv + Da) * hidden + 2 * B * hidden * c_pad

    # Double-buffered VMEM footprint of one grid step (inputs + output) plus
    # resident weights; generous margin, capped within every chip's default.
    vmem_need = 2 * 4 * tb * (T * (Dt + Dv + Da) + c_pad) + 2 * w_bytes
    vmem_limit = int(min(max(2 * vmem_need, 8 << 20), 32 << 20))

    kernel = pl.pallas_call(
        _mcn_fused_kernel,
        grid=grid,
        in_specs=[
            pl.BlockSpec((tb, T * Dt), lambda i: (i, 0)),        # batch-tiled inputs
            pl.BlockSpec((tb, T * Dv), lambda i: (i, 0)),
            pl.BlockSpec((tb, T * Da), lambda i: (i, 0)),
            pl.BlockSpec((T * Dt, hidden), lambda i: (0, 0)),    # resident weights
            pl.BlockSpec((T * Dv, hidden), lambda i: (0, 0)),
            pl.BlockSpec((T * Da, hidden), lambda i: (0, 0)),
            pl.BlockSpec((1, hidden), lambda i: (0, 0)),
            pl.BlockSpec((1, hidden), lambda i: (0, 0)),
            pl.BlockSpec((1, hidden), lambda i: (0, 0)),
            pl.BlockSpec((hidden, c_pad), lambda i: (0, 0)),
            pl.BlockSpec((1, c_pad), lambda i: (0, 0)),
        ],
        out_specs=pl.BlockSpec((tb, c_pad), lambda i: (i, 0)),
        out_shape=jax.ShapeDtypeStruct((B, c_pad), jnp.float32),
        compiler_params=pltpu.CompilerParams(
            # "parallel" is portable across v5e/v6e/v7x; on v7x this axis can
            # be switched to pltpu.CORE_PARALLEL (grid >= 2) to shard batch
            # tiles across the two TensorCores.
            dimension_semantics=("parallel",),
            vmem_limit_bytes=vmem_limit,
        ),
        cost_estimate=pl.CostEstimate(
            flops=flops, transcendentals=0,
            bytes_accessed=in_bytes + w_bytes + out_bytes),
    )
    out = kernel(t2, v2, a2,
                 packed["wt"], packed["wv"], packed["wa"],
                 packed["bt"], packed["bv"], packed["ba"],
                 packed["wc"], packed["bc"])
    return out[:, :num_classes]


# ----------------------- MCNModel wrapper semantics ------------------------- #
def mcn_model_forward(text, video, audio, mode="train", *, packed):
    # Exactly mirrors MCNModel.forward: pure delegation to the backbone.
    del mode  # the synthetic backbone is mode-agnostic (inference-style forward)
    return mcn_backbone_forward(text, video, audio, packed)


# ----------------------------- parameter init ------------------------------- #
def init_params(key, dt, dv, da, hidden, num_classes):
    ks = jax.random.split(key, 4)

    def linear(k, fan_in, fan_out):
        scale = 1.0 / jnp.sqrt(jnp.float32(fan_in))
        w = jax.random.uniform(k, (fan_in, fan_out), jnp.float32, -scale, scale)
        b = jnp.zeros((1, fan_out), jnp.float32)
        return w, b

    wt, bt = linear(ks[0], dt, hidden)
    wv, bv = linear(ks[1], dv, hidden)
    wa, ba = linear(ks[2], da, hidden)
    wc, bc = linear(ks[3], hidden, num_classes)
    return dict(wt=wt, bt=bt, wv=wv, bv=bv, wa=wa, ba=ba, wc=wc, bc=bc)


# Pure-JAX f32 reference (original, unfused semantics) for correctness check.
def _ref_forward(text, video, audio, p):
    t = jnp.mean(text, axis=1)
    v = jnp.mean(video, axis=1)
    a = jnp.mean(audio, axis=1)
    ht = jax.nn.relu(t @ p["wt"] + p["bt"])
    hv = jax.nn.relu(v @ p["wv"] + p["bv"])
    ha = jax.nn.relu(a @ p["wa"] + p["ba"])
    return (ht + hv + ha) @ p["wc"] + p["bc"]


if __name__ == "__main__":
    key = jax.random.PRNGKey(0)
    k_t, k_v, k_a, k_p = jax.random.split(key, 4)

    B, T = 16, 8             # batch, sequence length
    Dt, Dv, Da = 32, 32, 32  # per-modality feature dims
    H, C = 32, 8             # shared hidden size, num classes

    text = jax.random.normal(k_t, (B, T, Dt), jnp.float32)
    video = jax.random.normal(k_v, (B, T, Dv), jnp.float32)
    audio = jax.random.normal(k_a, (B, T, Da), jnp.float32)

    params = init_params(k_p, Dt, Dv, Da, H, C)
    packed = pack_params(params, seq_len=T)

    out = mcn_model_forward(text, video, audio, mode="train", packed=packed)
    out = jax.block_until_ready(out)

    ref = _ref_forward(text, video, audio, params)
    assert out.shape == (B, C)
    # bf16 MXU operands (f32 accumulation) => small quantization error vs f32 ref.
    assert jnp.allclose(out, ref, atol=2e-2, rtol=2e-2)

    print("KERNEL_OK")
</pallas_src>

<mosaic_0001>
module attributes {stable_mosaic.version = 11 : i64} {
  func.func @_mcn_fused_kernel(%arg0: i32, %arg1: memref<16x256xf32, #tpu.memory_space<vmem>>, %arg2: memref<16x256xf32, #tpu.memory_space<vmem>>, %arg3: memref<16x256xf32, #tpu.memory_space<vmem>>, %arg4: memref<256x32xbf16, #tpu.memory_space<vmem>>, %arg5: memref<256x32xbf16, #tpu.memory_space<vmem>>, %arg6: memref<256x32xbf16, #tpu.memory_space<vmem>>, %arg7: memref<1x32xf32, #tpu.memory_space<vmem>>, %arg8: memref<1x32xf32, #tpu.memory_space<vmem>>, %arg9: memref<1x32xf32, #tpu.memory_space<vmem>>, %arg10: memref<32x128xbf16, #tpu.memory_space<vmem>>, %arg11: memref<1x128xf32, #tpu.memory_space<vmem>>, %arg12: memref<16x128xf32, #tpu.memory_space<vmem>>) attributes {dimension_semantics = [#tpu.dimension_semantics<parallel>], iteration_bounds = array<i64: 1>, scalar_prefetch = 0 : i64, scratch_operands = 0 : i64, tpu.core_type = #tpu.core_type<tc>, window_params = [{transform_indices = @transform_0, window_bounds = array<i64: 16, 256>}, {transform_indices = @transform_1, window_bounds = array<i64: 16, 256>}, {transform_indices = @transform_2, window_bounds = array<i64: 16, 256>}, {pipeline_mode = #tpu.pipeline_mode<synchronous>, transform_indices = @transform_3, window_bounds = array<i64: 256, 32>}, {pipeline_mode = #tpu.pipeline_mode<synchronous>, transform_indices = @transform_4, window_bounds = array<i64: 256, 32>}, {pipeline_mode = #tpu.pipeline_mode<synchronous>, transform_indices = @transform_5, window_bounds = array<i64: 256, 32>}, {pipeline_mode = #tpu.pipeline_mode<synchronous>, transform_indices = @transform_6, window_bounds = array<i64: 1, 32>}, {pipeline_mode = #tpu.pipeline_mode<synchronous>, transform_indices = @transform_7, window_bounds = array<i64: 1, 32>}, {pipeline_mode = #tpu.pipeline_mode<synchronous>, transform_indices = @transform_8, window_bounds = array<i64: 1, 32>}, {pipeline_mode = #tpu.pipeline_mode<synchronous>, transform_indices = @transform_9, window_bounds = array<i64: 32, 128>}, {pipeline_mode = #tpu.pipeline_mode<synchronous>, transform_indices = @transform_10, window_bounds = array<i64: 1, 128>}, {transform_indices = @transform_11, window_bounds = array<i64: 16, 128>}]} {
    %c0 = arith.constant 0 : index
    %c0_0 = arith.constant 0 : index
    %0 = vector.load %arg1[%c0, %c0_0] : memref<16x256xf32, #tpu.memory_space<vmem>>, vector<16x256xf32>
    %1 = arith.truncf %0 : vector<16x256xf32> to vector<16x256xbf16>
    %c0_1 = arith.constant 0 : index
    %c0_2 = arith.constant 0 : index
    %2 = vector.load %arg4[%c0_1, %c0_2] : memref<256x32xbf16, #tpu.memory_space<vmem>>, vector<256x32xbf16>
    %cst = arith.constant dense<0.000000e+00> : vector<16x32xf32>
    %3 = tpu.matmul %1, %2, %cst {dimension_numbers = #tpu.dot_dimension_numbers<[1], [0], [0], [1], [0, 0, 1, 1], [], []>} : vector<16x256xbf16>, vector<256x32xbf16>, vector<16x32xf32> -> vector<16x32xf32>
    %c0_3 = arith.constant 0 : index
    %c0_4 = arith.constant 0 : index
    %4 = vector.load %arg2[%c0_3, %c0_4] : memref<16x256xf32, #tpu.memory_space<vmem>>, vector<16x256xf32>
    %5 = arith.truncf %4 : vector<16x256xf32> to vector<16x256xbf16>
    %c0_5 = arith.constant 0 : index
    %c0_6 = arith.constant 0 : index
    %6 = vector.load %arg5[%c0_5, %c0_6] : memref<256x32xbf16, #tpu.memory_space<vmem>>, vector<256x32xbf16>
    %cst_7 = arith.constant dense<0.000000e+00> : vector<16x32xf32>
    %7 = tpu.matmul %5, %6, %cst_7 {dimension_numbers = #tpu.dot_dimension_numbers<[1], [0], [0], [1], [0, 0, 1, 1], [], []>} : vector<16x256xbf16>, vector<256x32xbf16>, vector<16x32xf32> -> vector<16x32xf32>
    %c0_8 = arith.constant 0 : index
    %c0_9 = arith.constant 0 : index
    %8 = vector.load %arg3[%c0_8, %c0_9] : memref<16x256xf32, #tpu.memory_space<vmem>>, vector<16x256xf32>
    %9 = arith.truncf %8 : vector<16x256xf32> to vector<16x256xbf16>
    %c0_10 = arith.constant 0 : index
    %c0_11 = arith.constant 0 : index
    %10 = vector.load %arg6[%c0_10, %c0_11] : memref<256x32xbf16, #tpu.memory_space<vmem>>, vector<256x32xbf16>
    %cst_12 = arith.constant dense<0.000000e+00> : vector<16x32xf32>
    %11 = tpu.matmul %9, %10, %cst_12 {dimension_numbers = #tpu.dot_dimension_numbers<[1], [0], [0], [1], [0, 0, 1, 1], [], []>} : vector<16x256xbf16>, vector<256x32xbf16>, vector<16x32xf32> -> vector<16x32xf32>
    %c0_13 = arith.constant 0 : index
    %c0_14 = arith.constant 0 : index
    %12 = vector.load %arg7[%c0_13, %c0_14] : memref<1x32xf32, #tpu.memory_space<vmem>>, vector<1x32xf32>
    %13 = vector.broadcast %12 : vector<1x32xf32> to vector<16x32xf32>
    %14 = arith.addf %3, %13 : vector<16x32xf32>
    %cst_15 = arith.constant 0.000000e+00 : f32
    %15 = vector.broadcast %cst_15 : f32 to vector<16x32xf32>
    %16 = arith.maximumf %14, %15 : vector<16x32xf32>
    %c0_16 = arith.constant 0 : index
    %c0_17 = arith.constant 0 : index
    %17 = vector.load %arg8[%c0_16, %c0_17] : memref<1x32xf32, #tpu.memory_space<vmem>>, vector<1x32xf32>
    %18 = vector.broadcast %17 : vector<1x32xf32> to vector<16x32xf32>
    %19 = arith.addf %7, %18 : vector<16x32xf32>
    %cst_18 = arith.constant 0.000000e+00 : f32
    %20 = vector.broadcast %cst_18 : f32 to vector<16x32xf32>
    %21 = arith.maximumf %19, %20 : vector<16x32xf32>
    %c0_19 = arith.constant 0 : index
    %c0_20 = arith.constant 0 : index
    %22 = vector.load %arg9[%c0_19, %c0_20] : memref<1x32xf32, #tpu.memory_space<vmem>>, vector<1x32xf32>
    %23 = vector.broadcast %22 : vector<1x32xf32> to vector<16x32xf32>
    %24 = arith.addf %11, %23 : vector<16x32xf32>
    %cst_21 = arith.constant 0.000000e+00 : f32
    %25 = vector.broadcast %cst_21 : f32 to vector<16x32xf32>
    %26 = arith.maximumf %24, %25 : vector<16x32xf32>
    %27 = arith.addf %16, %21 : vector<16x32xf32>
    %28 = arith.addf %27, %26 : vector<16x32xf32>
    %29 = arith.truncf %28 : vector<16x32xf32> to vector<16x32xbf16>
    %c0_22 = arith.constant 0 : index
    %c0_23 = arith.constant 0 : index
    %30 = vector.load %arg10[%c0_22, %c0_23] : memref<32x128xbf16, #tpu.memory_space<vmem>>, vector<32x128xbf16>
    %cst_24 = arith.constant dense<0.000000e+00> : vector<16x128xf32>
    %31 = tpu.matmul %29, %30, %cst_24 {dimension_numbers = #tpu.dot_dimension_numbers<[1], [0], [0], [1], [0, 0, 1, 1], [], []>} : vector<16x32xbf16>, vector<32x128xbf16>, vector<16x128xf32> -> vector<16x128xf32>
    %c0_25 = arith.constant 0 : index
    %c0_26 = arith.constant 0 : index
    %32 = vector.load %arg11[%c0_25, %c0_26] : memref<1x128xf32, #tpu.memory_space<vmem>>, vector<1x128xf32>
    %33 = vector.broadcast %32 : vector<1x128xf32> to vector<16x128xf32>
    %34 = arith.addf %31, %33 : vector<16x128xf32>
    %c0_27 = arith.constant 0 : index
    %c0_28 = arith.constant 0 : index
    %35 = vector.load %arg12[%c0_27, %c0_28] : memref<16x128xf32, #tpu.memory_space<vmem>>, vector<16x128xf32>
    tpu.vector_store %arg12[%c0_27, %c0_28], %34 {strides = array<i32>} : memref<16x128xf32, #tpu.memory_space<vmem>>, vector<16x128xf32>,
    return
  }
  func.func @transform_0(%arg0: i32) -> (i32, i32) {
    %c0_i32 = arith.constant 0 : i32
    %c0_i32_0 = arith.constant 0 : i32
    return %arg0, %c0_i32 : i32, i32
  }
  func.func @transform_1(%arg0: i32) -> (i32, i32) {
    %c0_i32 = arith.constant 0 : i32
    %c0_i32_0 = arith.constant 0 : i32
    return %arg0, %c0_i32 : i32, i32
  }
  func.func @transform_2(%arg0: i32) -> (i32, i32) {
    %c0_i32 = arith.constant 0 : i32
    %c0_i32_0 = arith.constant 0 : i32
    return %arg0, %c0_i32 : i32, i32
  }
  func.func @transform_3(%arg0: i32) -> (i32, i32) {
    %c0_i32 = arith.constant 0 : i32
    %c0_i32_0 = arith.constant 0 : i32
    %c0_i32_1 = arith.constant 0 : i32
    return %c0_i32, %c0_i32_0 : i32, i32
  }
  func.func @transform_4(%arg0: i32) -> (i32, i32) {
    %c0_i32 = arith.constant 0 : i32
    %c0_i32_0 = arith.constant 0 : i32
    %c0_i32_1 = arith.constant 0 : i32
    return %c0_i32, %c0_i32_0 : i32, i32
  }
  func.func @transform_5(%arg0: i32) -> (i32, i32) {
    %c0_i32 = arith.constant 0 : i32
    %c0_i32_0 = arith.constant 0 : i32
    %c0_i32_1 = arith.constant 0 : i32
    return %c0_i32, %c0_i32_0 : i32, i32
  }
  func.func @transform_6(%arg0: i32) -> (i32, i32) {
    %c0_i32 = arith.constant 0 : i32
    %c0_i32_0 = arith.constant 0 : i32
    %c0_i32_1 = arith.constant 0 : i32
    return %c0_i32, %c0_i32_0 : i32, i32
  }
  func.func @transform_7(%arg0: i32) -> (i32, i32) {
    %c0_i32 = arith.constant 0 : i32
    %c0_i32_0 = arith.constant 0 : i32
    %c0_i32_1 = arith.constant 0 : i32
    return %c0_i32, %c0_i32_0 : i32, i32
  }
  func.func @transform_8(%arg0: i32) -> (i32, i32) {
    %c0_i32 = arith.constant 0 : i32
    %c0_i32_0 = arith.constant 0 : i32
    %c0_i32_1 = arith.constant 0 : i32
    return %c0_i32, %c0_i32_0 : i32, i32
  }
  func.func @transform_9(%arg0: i32) -> (i32, i32) {
    %c0_i32 = arith.constant 0 : i32
    %c0_i32_0 = arith.constant 0 : i32
    %c0_i32_1 = arith.constant 0 : i32
    return %c0_i32, %c0_i32_0 : i32, i32
  }
  func.func @transform_10(%arg0: i32) -> (i32, i32) {
    %c0_i32 = arith.constant 0 : i32
    %c0_i32_0 = arith.constant 0 : i32
    %c0_i32_1 = arith.constant 0 : i32
    return %c0_i32, %c0_i32_0 : i32, i32
  }
  func.func @transform_11(%arg0: i32) -> (i32, i32) {
    %c0_i32 = arith.constant 0 : i32
    %c0_i32_0 = arith.constant 0 : i32
    return %arg0, %c0_i32 : i32, i32
  }
}

</mosaic_0001>

<bundles_post_ra>
// kernel: tpu_custom_call.1
= control target key start
LH: loop header
LB: loop body
LE: loop exit
PB: predicated region body
PF: predicated region fallthrough
CT: control target
= control target key end

     0   :  { %s1155_s0 = inlined_call_operand.vmem [shape: f32[16,256], index: 0, kind: input, shape index: {}]   ;;  %s1156_s1 = inlined_call_operand.vmem [shape: f32[16,256], index: 1, kind: input, shape index: {}]   ;;  %s1157_s2 = inlined_call_operand.vmem [shape: f32[16,256], index: 2, kind: input, shape index: {}]   ;;  %s1158_s3 = inlined_call_operand.vmem [shape: bf16[256,32], index: 3, kind: input, shape index: {}]   ;;  %s1159_s4 = inlined_call_operand.vmem [shape: bf16[256,32], index: 4, kind: input, shape index: {}]   ;;  %s1160_s5 = inlined_call_operand.vmem [shape: bf16[256,32], index: 5, kind: input, shape index: {}]   ;;  %s1161_s6 = inlined_call_operand.vmem [shape: f32[1,32], index: 6, kind: input, shape index: {}]   ;;  %s1162_s7 = inlined_call_operand.vmem [shape: f32[1,32], index: 7, kind: input, shape index: {}]   ;;  %s1163_s8 = inlined_call_operand.vmem [shape: f32[1,32], index: 8, kind: input, shape index: {}]   ;;  %s1164_s9 = inlined_call_operand.vmem [shape: bf16[32,128], index: 9, kind: input, shape index: {}]   ;;  %s1165_s10 = inlined_call_operand.vmem [shape: f32[1,128], index: 10, kind: input, shape index: {}]   ;;  %s1166_s11 = inlined_call_operand.hbm [shape: f32[16,128], index: 11, kind: output, shape index: {}]  }
   0x1   :  { %v815_v0 = vld [vmem:[%s1158_s3 + $0x38] sm:$0xff]  ;;  %v814_v4 = vld [vmem:[%s1158_s3 + $0x30] sm:$0xff]  ;;  %v813_v8 = vld [vmem:[%s1158_s3 + $0x28] sm:$0xff] }
   0x2   :  { %v823_v1 = vld [vmem:[%s1158_s3 + $0x78] sm:$0xff]  ;;  %254 = vmatpush.bf16.msra.mxu0 %v815_v0  ;;  %v822_v5 = vld [vmem:[%s1158_s3 + $0x70] sm:$0xff]  ;;  %v821_v9 = vld [vmem:[%s1158_s3 + $0x68] sm:$0xff] }
   0x3   :  { %v831_v2 = vld [vmem:[%s1159_s4 + $0x38] sm:$0xff]  ;;  %268 = vmatpush.bf16.msra.mxu1 %v823_v1  ;;  %v830_v6 = vld [vmem:[%s1159_s4 + $0x30] sm:$0xff]  ;;  %v829_v10 = vld [vmem:[%s1159_s4 + $0x28] sm:$0xff] }
   0x4   :  { %v839_v3 = vld [vmem:[%s1159_s4 + $0x78] sm:$0xff]  ;;  %384 = vmatpush.bf16.msra.mxu2 %v831_v2  ;;  %v838_v7 = vld [vmem:[%s1159_s4 + $0x70] sm:$0xff]  ;;  %v837_v11 = vld [vmem:[%s1159_s4 + $0x68] sm:$0xff] }
   0x5   :  { %398 = vmatpush.bf16.msra.mxu3 %v839_v3  ;;  %v812_v12 = vld [vmem:[%s1158_s3 + $0x20] sm:$0xff]  ;;  %v811_v16 = vld [vmem:[%s1158_s3 + $0x18] sm:$0xff]  ;;  %v810_v20 = vld [vmem:[%s1158_s3 + $0x10] sm:$0xff] }
   0x6   :  { %255 = vmatpush.bf16.msra.mxu0 %v814_v4  ;;  %v820_v13 = vld [vmem:[%s1158_s3 + $0x60] sm:$0xff]  ;;  %v819_v17 = vld [vmem:[%s1158_s3 + $0x58] sm:$0xff]  ;;  %v818_v21 = vld [vmem:[%s1158_s3 + $0x50] sm:$0xff] }
   0x7   :  { %269 = vmatpush.bf16.msra.mxu1 %v822_v5  ;;  %v828_v14 = vld [vmem:[%s1159_s4 + $0x20] sm:$0xff]  ;;  %v827_v18 = vld [vmem:[%s1159_s4 + $0x18] sm:$0xff] }
   0x8   :  { %385 = vmatpush.bf16.msra.mxu2 %v830_v6  ;;  %v836_v15 = vld [vmem:[%s1159_s4 + $0x60] sm:$0xff]  ;;  %v835_v19 = vld [vmem:[%s1159_s4 + $0x58] sm:$0xff] }
   0x9   :  { %399 = vmatpush.bf16.msra.mxu3 %v838_v7 }
   0xa   :  { %256 = vmatpush.bf16.msra.mxu0 %v813_v8 }
   0xb   :  { %270 = vmatpush.bf16.msra.mxu1 %v821_v9 }
   0xc   :  { %386 = vmatpush.bf16.msra.mxu2 %v829_v10 }
   0xd   :  { %400 = vmatpush.bf16.msra.mxu3 %v837_v11 }
   0xe   :  { %257 = vmatpush.bf16.msra.mxu0 %v812_v12 }
   0xf   :  { %271 = vmatpush.bf16.msra.mxu1 %v820_v13 }
  0x10   :  { %387 = vmatpush.bf16.msra.mxu2 %v828_v14 }
  0x11   :  { %401 = vmatpush.bf16.msra.mxu3 %v836_v15 }
  0x12   :  { %258 = vmatpush.bf16.msra.mxu0 %v811_v16 }
  0x13   :  { %272 = vmatpush.bf16.msra.mxu1 %v819_v17 }
  0x14   :  { %16 = vsyncpa [#allocation3], 0  ;;  %388 = vmatpush.bf16.msra.mxu2 %v827_v18  ;;  %v826_v22 = vld [vmem:[%s1159_s4 + $0x10] sm:$0xff]  ;;  %v809_v24 = vld [vmem:[%s1158_s3 + $0x8] sm:$0xff]  ;;  %vm569_vm0 = vcmask 261120   ;;  %s595_s23 = sshll.u32 %s1166_s11, 4  ;;  %s596_s23 = int_to_ptr.hbm [resolvable:$true] %s595_s23 }
  0x15   :  { %402 = vmatpush.bf16.msra.mxu3 %v835_v19  ;;  %v834_v23 = vld [vmem:[%s1159_s4 + $0x50] sm:$0xff]  ;;  %v817_v25 = vld [vmem:[%s1158_s3 + $0x48] sm:$0xff]  ;;  %v808_v28 = vld [vmem:[%s1158_s3] sm:$0xff]  ;;  %s892_s24 = smov 128  }
  0x16   :  { %259 = vmatpush.bf16.msra.mxu0 %v810_v20  ;;  %v825_v26 = vld [vmem:[%s1159_s4 + $0x8] sm:$0xff]  ;;  %v816_v29 = vld [vmem:[%s1158_s3 + $0x40] sm:$0xff]  ;;  %v847_v31 = vld [vmem:[%s1160_s5 + $0x38] sm:$0xff] }
  0x17   :  { %273 = vmatpush.bf16.msra.mxu1 %v818_v21  ;;  %v833_v27 = vld [vmem:[%s1159_s4 + $0x48] sm:$0xff]  ;;  %v824_v30 = vld [vmem:[%s1159_s4] sm:$0xff]  ;;  %v42_v33 = vld [vmem:[%s1155_s0 + $0x10] sm:$0xff] }
  0x18   :  { %389 = vmatpush.bf16.msra.mxu2 %v826_v22  ;;  %v40_v32 = vld [vmem:[%s1155_s0] sm:$0xff]  ;;  %v41_v34 = vld [vmem:[%s1155_s0 + $0x8] sm:$0xff]  ;;  %v43_v35 = vld [vmem:[%s1155_s0 + $0x18] sm:$0xff] }
  0x19   :  { %403 = vmatpush.bf16.msra.mxu3 %v834_v23  ;;  %v855_v36 = vld [vmem:[%s1160_s5 + $0x78] sm:$0xff]  ;;  %v78_v37 = vld [vmem:[%s1156_s1] sm:$0xff]  ;;  %v80_v38 = vld [vmem:[%s1156_s1 + $0x10] sm:$0xff]  ;;  %v44_v42 = vpack.c.bf16 %v42_v33, %v40_v32  ;;  %v45_v43 = vpack.c.bf16 %v43_v35, %v41_v34 }
  0x1a   :  { %260 = vmatpush.bf16.msra.mxu0 %v809_v24  ;;  %v832_v39 = vld [vmem:[%s1159_s4 + $0x40] sm:$0xff]  ;;  %v79_v40 = vld [vmem:[%s1156_s1 + $0x8] sm:$0xff]  ;;  %v81_v41 = vld [vmem:[%s1156_s1 + $0x18] sm:$0xff]  ;;  %v82_v44 = vpack.c.bf16 %v80_v38, %v78_v37  ;;  %s893_s4 = smov 8  }
  0x1b   :  { %274 = vmatpush.bf16.msra.mxu1 %v817_v25  ;;  %v83_v45 = vpack.c.bf16 %v81_v41, %v79_v40  ;;  %v846_v46 = vld [vmem:[%s1160_s5 + $0x30] sm:$0xff]  ;;  %v845_v48 = vld [vmem:[%s1160_s5 + $0x28] sm:$0xff]  ;;  %v844_v50 = vld [vmem:[%s1160_s5 + $0x20] sm:$0xff] }
  0x1c   :  { %390 = vmatpush.bf16.msra.mxu2 %v825_v26  ;;  %v854_v47 = vld [vmem:[%s1160_s5 + $0x70] sm:$0xff]  ;;  %v853_v49 = vld [vmem:[%s1160_s5 + $0x68] sm:$0xff]  ;;  %v852_v51 = vld [vmem:[%s1160_s5 + $0x60] sm:$0xff] }
  0x1d   :  { %404 = vmatpush.bf16.msra.mxu3 %v833_v27  ;;  %v843_v52 = vld [vmem:[%s1160_s5 + $0x18] sm:$0xff]  ;;  %v842_v54 = vld [vmem:[%s1160_s5 + $0x10] sm:$0xff]  ;;  %v841_v56 = vld [vmem:[%s1160_s5 + $0x8] sm:$0xff] }
  0x1e   :  { %261 = vmatpush.bf16.msra.mxu0 %v808_v28  ;;  %v851_v53 = vld [vmem:[%s1160_s5 + $0x58] sm:$0xff]  ;;  %v850_v55 = vld [vmem:[%s1160_s5 + $0x50] sm:$0xff]  ;;  %v849_v57 = vld [vmem:[%s1160_s5 + $0x48] sm:$0xff] }
  0x1f   :  { %275 = vmatpush.bf16.msra.mxu1 %v816_v29  ;;  %v840_v58 = vld [vmem:[%s1160_s5] sm:$0xff]  ;;  %v118_v60 = vld [vmem:[%s1157_s2 + $0x10] sm:$0xff]  ;;  %v117_v62 = vld [vmem:[%s1157_s2 + $0x8] sm:$0xff] }
  0x20   :  { %391 = vmatpush.bf16.msra.mxu2 %v824_v30  ;;  %v116_v59 = vld [vmem:[%s1157_s2] sm:$0xff]  ;;  %v119_v63 = vld [vmem:[%s1157_s2 + $0x18] sm:$0xff]  ;;  %v857_v2 = vld [vmem:[%s1164_s9 + $0x8] sm:$0xff] }
  0x21   :  { %405 = vmatpush.bf16.msra.mxu3 %v832_v39  ;;  %262 = vmatmul.bf16.vlgmr.msra.gmra.mxu0 %v44_v42  ;;  %v848_v61 = vld [vmem:[%s1160_s5 + $0x40] sm:$0xff]  ;;  %v120_v0 = vpack.c.bf16 %v118_v60, %v116_v59  ;;  %v121_v1 = vpack.c.bf16 %v119_v63, %v117_v62 }
  0x22   :  { %514 = vmatpush.bf16.msrb.mxu0 %v847_v31  ;;  %276 = vmatmul.bf16.vlgmr.msra.gmra.mxu1 %v45_v43  ;;  %v856_v5 = vld [vmem:[%s1164_s9] sm:$0xff] }
  0x23   :  { %528 = vmatpush.bf16.msrb.mxu1 %v855_v36  ;;  %392 = vmatmul.bf16.vlgmr.msra.gmra.mxu2 %v82_v44  ;;  %v861_v10 = vld [vmem:[%s1161_s6] ss:$0 sm:$0xff] }
  0x24   :  { %406 = vmatmul.bf16.vlgmr.msra.gmra.mxu3 %v83_v45  ;;  %579 = vmatpush.bf16.msrb.mxu2 %v857_v2  ;;  %v862_v11 = vld [vmem:[%s1162_s7] ss:$0 sm:$0xff] }
  0x25   :  { %v863_v13 = vld [vmem:[%s1163_s8] ss:$0 sm:$0xff]  ;;  %s891_s8 = smov [#allocation2]  }
  0x26   :  { %515 = vmatpush.bf16.msrb.mxu0 %v846_v46  ;;  %v864_v42 = vld [vmem:[%s1165_s10] ss:$0 sm:$0xff]  ;;  %s593_s9 = sshll.u32 %s891_s8, 4  ;;  %s594_s9 = int_to_ptr.vmem [resolvable:$true] %s593_s9 }
  0x27   :  { %529 = vmatpush.bf16.msrb.mxu1 %v854_v47 }
  0x28   :  { %580 = vmatpush.bf16.msrb.mxu2 %v856_v5 }
  0x2a   :  { %516 = vmatpush.bf16.msrb.mxu0 %v845_v48 }
  0x2b   :  { %530 = vmatpush.bf16.msrb.mxu1 %v853_v49 }
  0x2e   :  { %517 = vmatpush.bf16.msrb.mxu0 %v844_v50 }
  0x2f   :  { %531 = vmatpush.bf16.msrb.mxu1 %v852_v51 }
  0x32   :  { %518 = vmatpush.bf16.msrb.mxu0 %v843_v52 }
  0x33   :  { %532 = vmatpush.bf16.msrb.mxu1 %v851_v53 }
  0x36   :  { %519 = vmatpush.bf16.msrb.mxu0 %v842_v54 }
  0x37   :  { %533 = vmatpush.bf16.msrb.mxu1 %v850_v55 }
  0x3a   :  { %520 = vmatpush.bf16.msrb.mxu0 %v841_v56 }
  0x3b   :  { %534 = vmatpush.bf16.msrb.mxu1 %v849_v57 }
  0x3e   :  { %521 = vmatpush.bf16.msrb.mxu0 %v840_v58 }
  0x3f   :  { %535 = vmatpush.bf16.msrb.mxu1 %v848_v61 }
  0x41   :  { %522 = vmatmul.bf16.vlgmr.msrb.gmra.mxu0 %v120_v0 }
  0x42   :  { %536 = vmatmul.bf16.vlgmr.msrb.gmra.mxu1 %v121_v1 }
  0x9e   :  { %v263_v3 = vpop.f32.mrf.mxu0 }
  0x9f   :  { %v277_v4 = vpop.f32.mrf.mxu1  ;;  %v264_v14 = vadd.f32 %v861_v10, %v263_v3 }
  0xa1   :  { %v278_v22 = vadd.f32 %v277_v4, %v264_v14 }
  0xa3   :  { %v282_v27 = vmax.f32 %v278_v22, 0.0 }
  0xa6   :  { %v393_v6 = vpop.f32.mrf.mxu2  ;;  %v265_v8 = vpop.f32.mrf.mxu0 }
  0xa7   :  { %v407_v7 = vpop.f32.mrf.mxu3  ;;  %v279_v9 = vpop.f32.mrf.mxu1  ;;  %v394_v16 = vadd.f32 %v862_v11, %v393_v6  ;;  %v266_v17 = vadd.f32 %v861_v10, %v265_v8 }
  0xa9   :  { %v408_v23 = vadd.f32 %v407_v7, %v394_v16  ;;  %v280_v24 = vadd.f32 %v279_v9, %v266_v17 }
  0xab   :  { %v412_v29 = vmax.f32 %v408_v23, 0.0  ;;  %v283_v30 = vmax.f32 %v280_v24, 0.0 }
  0xad   :  { %v544_v36 = vadd.f32 %v412_v29, %v282_v27 }
  0xae   :  { %v395_v12 = vpop.f32.mrf.mxu2 }
  0xaf   :  { %v396_v18 = vadd.f32 %v862_v11, %v395_v12  ;;  %v409_v20 = vpop.f32.mrf.mxu3 }
  0xb1   :  { %v410_v25 = vadd.f32 %v409_v20, %v396_v18 }
  0xb3   :  { %v413_v31 = vmax.f32 %v410_v25, 0.0 }
  0xb5   :  { %v545_v37 = vadd.f32 %v413_v31, %v283_v30 }
  0xbe   :  { %v523_v15 = vpop.f32.mrf.mxu0 }
  0xbf   :  { %v537_v19 = vpop.f32.mrf.mxu1  ;;  %v524_v21 = vadd.f32 %v863_v13, %v523_v15 }
  0xc1   :  { %v538_v26 = vadd.f32 %v537_v19, %v524_v21 }
  0xc3   :  { %v542_v34 = vmax.f32 %v538_v26, 0.0 }
  0xc5   :  { %v546_v39 = vadd.f32 %v544_v36, %v542_v34 }
  0xc6   :  { %v525_v28 = vpop.f32.mrf.mxu0 }
  0xc7   :  { %v526_v32 = vadd.f32 %v863_v13, %v525_v28  ;;  %v539_v33 = vpop.f32.mrf.mxu1 }
  0xc9   :  { %v540_v35 = vadd.f32 %v539_v33, %v526_v32 }
  0xcb   :  { %v543_v38 = vmax.f32 %v540_v35, 0.0 }
  0xcd   :  { %v547_v40 = vadd.f32 %v545_v37, %v543_v38 }
  0xcf   :  { %v548_v41 = vpack.c.bf16 %v547_v40, %v546_v39 }
  0xd1   :  { %807 = vmatmul.msk.bf16.vlgmr.msrb.gmra.mxu2 %vm569_vm0, %v548_v41 }
 0x154   :  { %v582_v43 = vpop.f32.mrf.mxu2 }
 0x155   :  { %v583_v44 = vadd.f32 %v864_v42, %v582_v43 }
 0x157   :  { %587 = vst [vmem:[#allocation2] sm:$0xff] %v583_v44 }
 0x15c   :  { %v584_v45 = vpop.f32.mrf.mxu2 }
 0x15d   :  { %v585_v46 = vadd.f32 %v864_v42, %v584_v45 }
 0x15f   :  { %588 = vst [vmem:[#allocation2 + $0x8] sm:$0xff] %v585_v46 }
 0x160   :  { %601 = dma.vmem_to_hbm [thread:$0]  %s594_s9, 256, %s596_s23, [#allocation3], %s892_s24, %s892_s24, %s893_s4  }
 0x161   :  { %889 = dma.done.wait [#allocation3], 256  }
 0x162   :  { %890 = vsyncadd [#allocation3], 4294967040 }
 0x163   :  { %606 = vsyncpa [#allocation3], 1 }

</bundles_post_ra>
